<compile_context>
chip_gen: v5e
topology: v5e:2x2
jax: 0.10.0
libtpu: 0.0.40
codegen_flags: <defaults>
</compile_context>

<pallas_src>
import jax
import jax.numpy as jnp
from jax.experimental import pallas as pl
from jax.experimental.pallas import tpu as pltpu


def _autoencoder_kernel(x_ref,
                        w1_ref, b1_ref,
                        w2_ref, b2_ref,
                        w3_ref, b3_ref,
                        w4_ref, b4_ref,
                        out_ref):
    # Weights arrive pre-transposed (in, out) and already bf16.
    x = x_ref[...]
    if x.dtype != jnp.bfloat16:
        x = x.astype(jnp.bfloat16)          # in-kernel cast (VPU filler under DMA)

    # Encoder fc1 + relu
    h1 = jnp.dot(x, w1_ref[...], preferred_element_type=jnp.float32) + b1_ref[...]
    h1 = jnp.maximum(h1, 0.0).astype(jnp.bfloat16)

    # Encoder fc2 + relu (bottleneck)
    z = jnp.dot(h1, w2_ref[...], preferred_element_type=jnp.float32) + b2_ref[...]
    z = jnp.maximum(z, 0.0).astype(jnp.bfloat16)

    # Decoder fc1 + relu
    h2 = jnp.dot(z, w3_ref[...], preferred_element_type=jnp.float32) + b3_ref[...]
    h2 = jnp.maximum(h2, 0.0).astype(jnp.bfloat16)

    # Decoder fc2 + sigmoid (exact: exp on EUP, exact reciprocal -- EUP has slack)
    y = jnp.dot(h2, w4_ref[...], preferred_element_type=jnp.float32) + b4_ref[...]
    sig = pl.reciprocal(1.0 + jnp.exp(-y))   # approx=False (default): exact sigmoid
    out_ref[...] = sig.astype(out_ref.dtype)


def _choose_batch_tile(B, block_batch):
    """Largest multiple of 8 <= block_batch that divides B (=> no padding).

    If the whole batch fits in one tile, split once so the grid has >= 2
    iterations (keeps both v7x TensorCores busy via "parallel" semantics).
    Returns None if B is not a multiple of 8.
    """
    cap = max(8, min(block_batch, B))
    tb = None
    for cand in range(8, cap + 1, 8):
        if B % cand == 0:
            tb = cand
    if tb is None:
        return None
    if tb == B and B >= 16 and B % 16 == 0:
        tb = B // 2
    return tb


def autoencoder_forward(x, params, *, block_batch=512, out_dtype=jnp.bfloat16):
    """x: [B, input_dim]. params: PyTorch-layout (out,in) weights + (1,out) biases."""
    B, input_dim = x.shape
    hidden_dim = params["w1"].shape[0]
    bottleneck_dim = params["w2"].shape[0]
    output_dim = params["w4"].shape[0]

    # --- one-time wrapper-side weight prep: transpose to (in, out), cast to bf16 ---
    w1 = params["w1"].T.astype(jnp.bfloat16)   # (input_dim,      hidden_dim)
    w2 = params["w2"].T.astype(jnp.bfloat16)   # (hidden_dim,     bottleneck_dim)
    w3 = params["w3"].T.astype(jnp.bfloat16)   # (bottleneck_dim, hidden_dim)
    w4 = params["w4"].T.astype(jnp.bfloat16)   # (hidden_dim,     output_dim)
    b1, b2, b3, b4 = params["b1"], params["b2"], params["b3"], params["b4"]  # f32 (1, out)

    # --- batch tiling: TB rows per grid step, weights stay VMEM-resident ---
    TB = _choose_batch_tile(B, block_batch)
    if TB is None:
        # Ragged batch: minimal pad to a multiple of 8 (< 8 extra rows).
        Bp = ((B + 7) // 8) * 8
        x_in = jnp.pad(x, ((0, Bp - B), (0, 0)))
        TB = _choose_batch_tile(Bp, block_batch)
    else:
        Bp, x_in = B, x
    num_blocks = Bp // TB

    def resident(shape):
        # full-array block, same block index every grid step -> stays in VMEM
        return pl.BlockSpec(shape, lambda i: (0, 0))

    x_bytes = x_in.size * x_in.dtype.itemsize
    out_bytes = Bp * output_dim * jnp.dtype(out_dtype).itemsize
    flops = 2 * Bp * (input_dim * hidden_dim
                      + hidden_dim * bottleneck_dim
                      + bottleneck_dim * hidden_dim
                      + hidden_dim * output_dim)
    bytes_accessed = (x_bytes + out_bytes
                      + (w1.size + w2.size + w3.size + w4.size) * 2
                      + (b1.size + b2.size + b3.size + b4.size) * 4)

    out = pl.pallas_call(
        _autoencoder_kernel,
        out_shape=jax.ShapeDtypeStruct((Bp, output_dim), out_dtype),
        grid_spec=pltpu.PrefetchScalarGridSpec(
            num_scalar_prefetch=0,
            grid=(num_blocks,),
            in_specs=[
                pl.BlockSpec((TB, input_dim), lambda i: (i, 0)),   # x: batch-tiled
                resident((input_dim, hidden_dim)),      resident((1, hidden_dim)),
                resident((hidden_dim, bottleneck_dim)), resident((1, bottleneck_dim)),
                resident((bottleneck_dim, hidden_dim)), resident((1, hidden_dim)),
                resident((hidden_dim, output_dim)),     resident((1, output_dim)),
            ],
            out_specs=pl.BlockSpec((TB, output_dim), lambda i: (i, 0)),
        ),
        compiler_params=pltpu.CompilerParams(
            dimension_semantics=("parallel",),          # megacore sharding on v7x
        ),
        cost_estimate=pl.CostEstimate(
            flops=flops,
            transcendentals=Bp * output_dim,
            bytes_accessed=bytes_accessed,
        ),
    )(x_in, w1, b1, w2, b2, w3, b3, w4, b4)

    return out[:B] if Bp != B else out


def init_params(key, input_dim, hidden_dim, bottleneck_dim, output_dim):
    """Deterministic synthetic parameters matching nn.Linear shapes (out, in)."""
    ks = jax.random.split(key, 8)

    def linear(kw, kb, fan_out, fan_in):
        bound = 1.0 / jnp.sqrt(fan_in)
        w = jax.random.uniform(kw, (fan_out, fan_in), jnp.float32, -bound, bound)
        # biases kept 2D (1, fan_out) for TPU-friendly layout; broadcasts over batch
        b = jax.random.uniform(kb, (1, fan_out), jnp.float32, -bound, bound)
        return w, b

    w1, b1 = linear(ks[0], ks[1], hidden_dim, input_dim)        # encoder.fc1
    w2, b2 = linear(ks[2], ks[3], bottleneck_dim, hidden_dim)   # encoder.fc2
    w3, b3 = linear(ks[4], ks[5], hidden_dim, bottleneck_dim)   # decoder.fc1
    w4, b4 = linear(ks[6], ks[7], output_dim, hidden_dim)       # decoder.fc2
    return dict(w1=w1, b1=b1, w2=w2, b2=b2, w3=w3, b3=b3, w4=w4, b4=b4)


def reference_forward(x, p):
    h1 = jnp.maximum(x @ p["w1"].T + p["b1"], 0.0)
    z = jnp.maximum(h1 @ p["w2"].T + p["b2"], 0.0)
    h2 = jnp.maximum(z @ p["w3"].T + p["b3"], 0.0)
    return jax.nn.sigmoid(h2 @ p["w4"].T + p["b4"])


if __name__ == "__main__":
    key = jax.random.PRNGKey(0)
    k_x, k_p = jax.random.split(key)

    batch = 128
    input_dim = 128
    hidden_dim = 64
    bottleneck_dim = 32
    output_dim = 128

    x = jax.random.normal(k_x, (batch, input_dim), jnp.float32)
    params = init_params(k_p, input_dim, hidden_dim, bottleneck_dim, output_dim)

    # TB=64 -> grid=(2,) (no padding, both v7x TCs busy); output in bf16.
    out = autoencoder_forward(x, params)
    out = jax.block_until_ready(out)

    ref = reference_forward(x, params)
    assert out.shape == (batch, output_dim)
    # bf16 MXU inputs + bf16 output quantization; exact sigmoid -> tight tolerance
    err = float(jnp.max(jnp.abs(out.astype(jnp.float32) - ref)))
    assert jnp.allclose(out.astype(jnp.float32), ref, atol=1e-2, rtol=1e-2), err

    print("KERNEL_OK")
</pallas_src>

<mosaic_0001>
module attributes {stable_mosaic.version = 11 : i64} {
  func.func @_autoencoder_kernel(%arg0: i32, %arg1: memref<64x128xf32, #tpu.memory_space<vmem>>, %arg2: memref<128x64xbf16, #tpu.memory_space<vmem>>, %arg3: memref<1x64xf32, #tpu.memory_space<vmem>>, %arg4: memref<64x32xbf16, #tpu.memory_space<vmem>>, %arg5: memref<1x32xf32, #tpu.memory_space<vmem>>, %arg6: memref<32x64xbf16, #tpu.memory_space<vmem>>, %arg7: memref<1x64xf32, #tpu.memory_space<vmem>>, %arg8: memref<64x128xbf16, #tpu.memory_space<vmem>>, %arg9: memref<1x128xf32, #tpu.memory_space<vmem>>, %arg10: memref<64x128xbf16, #tpu.memory_space<vmem>>) attributes {dimension_semantics = [#tpu.dimension_semantics<parallel>], iteration_bounds = array<i64: 2>, scalar_prefetch = 0 : i64, scratch_operands = 0 : i64, tpu.core_type = #tpu.core_type<tc>, window_params = [{transform_indices = @transform_0, window_bounds = array<i64: 64, 128>}, {pipeline_mode = #tpu.pipeline_mode<synchronous>, transform_indices = @transform_1, window_bounds = array<i64: 128, 64>}, {pipeline_mode = #tpu.pipeline_mode<synchronous>, transform_indices = @transform_2, window_bounds = array<i64: 1, 64>}, {pipeline_mode = #tpu.pipeline_mode<synchronous>, transform_indices = @transform_3, window_bounds = array<i64: 64, 32>}, {pipeline_mode = #tpu.pipeline_mode<synchronous>, transform_indices = @transform_4, window_bounds = array<i64: 1, 32>}, {pipeline_mode = #tpu.pipeline_mode<synchronous>, transform_indices = @transform_5, window_bounds = array<i64: 32, 64>}, {pipeline_mode = #tpu.pipeline_mode<synchronous>, transform_indices = @transform_6, window_bounds = array<i64: 1, 64>}, {pipeline_mode = #tpu.pipeline_mode<synchronous>, transform_indices = @transform_7, window_bounds = array<i64: 64, 128>}, {pipeline_mode = #tpu.pipeline_mode<synchronous>, transform_indices = @transform_8, window_bounds = array<i64: 1, 128>}, {transform_indices = @transform_9, window_bounds = array<i64: 64, 128>}]} {
    %c0 = arith.constant 0 : index
    %c0_0 = arith.constant 0 : index
    %0 = vector.load %arg1[%c0, %c0_0] : memref<64x128xf32, #tpu.memory_space<vmem>>, vector<64x128xf32>
    %1 = arith.truncf %0 : vector<64x128xf32> to vector<64x128xbf16>
    %c0_1 = arith.constant 0 : index
    %c0_2 = arith.constant 0 : index
    %2 = vector.load %arg2[%c0_1, %c0_2] : memref<128x64xbf16, #tpu.memory_space<vmem>>, vector<128x64xbf16>
    %cst = arith.constant dense<0.000000e+00> : vector<64x64xf32>
    %3 = tpu.matmul %1, %2, %cst {dimension_numbers = #tpu.dot_dimension_numbers<[1], [0], [0], [1], [0, 0, 1, 1], [], []>} : vector<64x128xbf16>, vector<128x64xbf16>, vector<64x64xf32> -> vector<64x64xf32>
    %c0_3 = arith.constant 0 : index
    %c0_4 = arith.constant 0 : index
    %4 = vector.load %arg3[%c0_3, %c0_4] : memref<1x64xf32, #tpu.memory_space<vmem>>, vector<1x64xf32>
    %5 = vector.broadcast %4 : vector<1x64xf32> to vector<64x64xf32>
    %6 = arith.addf %3, %5 : vector<64x64xf32>
    %cst_5 = arith.constant 0.000000e+00 : f32
    %7 = vector.broadcast %cst_5 : f32 to vector<64x64xf32>
    %8 = arith.maximumf %6, %7 : vector<64x64xf32>
    %9 = arith.truncf %8 : vector<64x64xf32> to vector<64x64xbf16>
    %c0_6 = arith.constant 0 : index
    %c0_7 = arith.constant 0 : index
    %10 = vector.load %arg4[%c0_6, %c0_7] : memref<64x32xbf16, #tpu.memory_space<vmem>>, vector<64x32xbf16>
    %cst_8 = arith.constant dense<0.000000e+00> : vector<64x32xf32>
    %11 = tpu.matmul %9, %10, %cst_8 {dimension_numbers = #tpu.dot_dimension_numbers<[1], [0], [0], [1], [0, 0, 1, 1], [], []>} : vector<64x64xbf16>, vector<64x32xbf16>, vector<64x32xf32> -> vector<64x32xf32>
    %c0_9 = arith.constant 0 : index
    %c0_10 = arith.constant 0 : index
    %12 = vector.load %arg5[%c0_9, %c0_10] : memref<1x32xf32, #tpu.memory_space<vmem>>, vector<1x32xf32>
    %13 = vector.broadcast %12 : vector<1x32xf32> to vector<64x32xf32>
    %14 = arith.addf %11, %13 : vector<64x32xf32>
    %cst_11 = arith.constant 0.000000e+00 : f32
    %15 = vector.broadcast %cst_11 : f32 to vector<64x32xf32>
    %16 = arith.maximumf %14, %15 : vector<64x32xf32>
    %17 = arith.truncf %16 : vector<64x32xf32> to vector<64x32xbf16>
    %c0_12 = arith.constant 0 : index
    %c0_13 = arith.constant 0 : index
    %18 = vector.load %arg6[%c0_12, %c0_13] : memref<32x64xbf16, #tpu.memory_space<vmem>>, vector<32x64xbf16>
    %cst_14 = arith.constant dense<0.000000e+00> : vector<64x64xf32>
    %19 = tpu.matmul %17, %18, %cst_14 {dimension_numbers = #tpu.dot_dimension_numbers<[1], [0], [0], [1], [0, 0, 1, 1], [], []>} : vector<64x32xbf16>, vector<32x64xbf16>, vector<64x64xf32> -> vector<64x64xf32>
    %c0_15 = arith.constant 0 : index
    %c0_16 = arith.constant 0 : index
    %20 = vector.load %arg7[%c0_15, %c0_16] : memref<1x64xf32, #tpu.memory_space<vmem>>, vector<1x64xf32>
    %21 = vector.broadcast %20 : vector<1x64xf32> to vector<64x64xf32>
    %22 = arith.addf %19, %21 : vector<64x64xf32>
    %cst_17 = arith.constant 0.000000e+00 : f32
    %23 = vector.broadcast %cst_17 : f32 to vector<64x64xf32>
    %24 = arith.maximumf %22, %23 : vector<64x64xf32>
    %25 = arith.truncf %24 : vector<64x64xf32> to vector<64x64xbf16>
    %c0_18 = arith.constant 0 : index
    %c0_19 = arith.constant 0 : index
    %26 = vector.load %arg8[%c0_18, %c0_19] : memref<64x128xbf16, #tpu.memory_space<vmem>>, vector<64x128xbf16>
    %cst_20 = arith.constant dense<0.000000e+00> : vector<64x128xf32>
    %27 = tpu.matmul %25, %26, %cst_20 {dimension_numbers = #tpu.dot_dimension_numbers<[1], [0], [0], [1], [0, 0, 1, 1], [], []>} : vector<64x64xbf16>, vector<64x128xbf16>, vector<64x128xf32> -> vector<64x128xf32>
    %c0_21 = arith.constant 0 : index
    %c0_22 = arith.constant 0 : index
    %28 = vector.load %arg9[%c0_21, %c0_22] : memref<1x128xf32, #tpu.memory_space<vmem>>, vector<1x128xf32>
    %29 = vector.broadcast %28 : vector<1x128xf32> to vector<64x128xf32>
    %30 = arith.addf %27, %29 : vector<64x128xf32>
    %cst_23 = arith.constant 0.000000e+00 : f32
    %31 = vector.broadcast %cst_23 : f32 to vector<64x128xf32>
    %32 = arith.subf %31, %30 : vector<64x128xf32>
    %33 = math.exp %32 : vector<64x128xf32>
    %cst_24 = arith.constant 1.000000e+00 : f32
    %34 = vector.broadcast %cst_24 : f32 to vector<64x128xf32>
    %35 = arith.addf %34, %33 : vector<64x128xf32>
    %36 = tpu.reciprocal %35 : vector<64x128xf32> -> vector<64x128xf32>
    %37 = arith.truncf %36 : vector<64x128xf32> to vector<64x128xbf16>
    %c0_25 = arith.constant 0 : index
    %c0_26 = arith.constant 0 : index
    %38 = vector.load %arg10[%c0_25, %c0_26] : memref<64x128xbf16, #tpu.memory_space<vmem>>, vector<64x128xbf16>
    tpu.vector_store %arg10[%c0_25, %c0_26], %37 {strides = array<i32>} : memref<64x128xbf16, #tpu.memory_space<vmem>>, vector<64x128xbf16>,
    return
  }
  func.func @transform_0(%arg0: i32) -> (i32, i32) {
    %c0_i32 = arith.constant 0 : i32
    %c0_i32_0 = arith.constant 0 : i32
    return %arg0, %c0_i32 : i32, i32
  }
  func.func @transform_1(%arg0: i32) -> (i32, i32) {
    %c0_i32 = arith.constant 0 : i32
    %c0_i32_0 = arith.constant 0 : i32
    %c0_i32_1 = arith.constant 0 : i32
    return %c0_i32, %c0_i32_0 : i32, i32
  }
  func.func @transform_2(%arg0: i32) -> (i32, i32) {
    %c0_i32 = arith.constant 0 : i32
    %c0_i32_0 = arith.constant 0 : i32
    %c0_i32_1 = arith.constant 0 : i32
    return %c0_i32, %c0_i32_0 : i32, i32
  }
  func.func @transform_3(%arg0: i32) -> (i32, i32) {
    %c0_i32 = arith.constant 0 : i32
    %c0_i32_0 = arith.constant 0 : i32
    %c0_i32_1 = arith.constant 0 : i32
    return %c0_i32, %c0_i32_0 : i32, i32
  }
  func.func @transform_4(%arg0: i32) -> (i32, i32) {
    %c0_i32 = arith.constant 0 : i32
    %c0_i32_0 = arith.constant 0 : i32
    %c0_i32_1 = arith.constant 0 : i32
    return %c0_i32, %c0_i32_0 : i32, i32
  }
  func.func @transform_5(%arg0: i32) -> (i32, i32) {
    %c0_i32 = arith.constant 0 : i32
    %c0_i32_0 = arith.constant 0 : i32
    %c0_i32_1 = arith.constant 0 : i32
    return %c0_i32, %c0_i32_0 : i32, i32
  }
  func.func @transform_6(%arg0: i32) -> (i32, i32) {
    %c0_i32 = arith.constant 0 : i32
    %c0_i32_0 = arith.constant 0 : i32
    %c0_i32_1 = arith.constant 0 : i32
    return %c0_i32, %c0_i32_0 : i32, i32
  }
  func.func @transform_7(%arg0: i32) -> (i32, i32) {
    %c0_i32 = arith.constant 0 : i32
    %c0_i32_0 = arith.constant 0 : i32
    %c0_i32_1 = arith.constant 0 : i32
    return %c0_i32, %c0_i32_0 : i32, i32
  }
  func.func @transform_8(%arg0: i32) -> (i32, i32) {
    %c0_i32 = arith.constant 0 : i32
    %c0_i32_0 = arith.constant 0 : i32
    %c0_i32_1 = arith.constant 0 : i32
    return %c0_i32, %c0_i32_0 : i32, i32
  }
  func.func @transform_9(%arg0: i32) -> (i32, i32) {
    %c0_i32 = arith.constant 0 : i32
    %c0_i32_0 = arith.constant 0 : i32
    return %arg0, %c0_i32 : i32, i32
  }
}

</mosaic_0001>

<bundles_post_ra>
// kernel: tpu_custom_call.1
= control target key start
LH: loop header
LB: loop body
LE: loop exit
PB: predicated region body
PF: predicated region fallthrough
CT: control target
= control target key end

     0   :  { %14 = vsyncpa [#allocation3], 0  ;;  %s1554_s0 = inlined_call_operand.vmem [shape: f32[128,128], index: 0, kind: input, shape index: {}]   ;;  %s1555_s1 = inlined_call_operand.vmem [shape: bf16[128,64], index: 1, kind: input, shape index: {}]   ;;  %s1556_s2 = inlined_call_operand.vmem [shape: f32[1,64], index: 2, kind: input, shape index: {}]   ;;  %s1557_s3 = inlined_call_operand.vmem [shape: bf16[64,32], index: 3, kind: input, shape index: {}]   ;;  %s1558_s4 = inlined_call_operand.vmem [shape: f32[1,32], index: 4, kind: input, shape index: {}]   ;;  %s1559_s5 = inlined_call_operand.vmem [shape: bf16[32,64], index: 5, kind: input, shape index: {}]   ;;  %s1560_s6 = inlined_call_operand.vmem [shape: f32[1,64], index: 6, kind: input, shape index: {}]   ;;  %s1561_s7 = inlined_call_operand.hbm [shape: bf16[64,128], index: 7, kind: input, shape index: {}]   ;;  %s1562_s8 = inlined_call_operand.vmem [shape: f32[1,128], index: 8, kind: input, shape index: {}]   ;;  %s1563_s9 = inlined_call_operand.hbm [shape: bf16[128,128], index: 9, kind: output, shape index: {}]  }
   0x1   :  { %15 = vsyncpa [#allocation4], 0 }
   0x2   :  { %17 = vsyncpa [#allocation4 + $0x1], 0  ;;  %s1347_s30 = smov 0   ;;  %s1349_s10 = smov 0  }
   0x3   :  { %s1351_s11 = smov 0   ;;  %s1353_s12 = smov 0  }
   0x4 LB: > { %s1368_s13 = sadd.s32 4294967295, %s1290_s12   ;;  %s964_s14 = sadd.s32 4294967294, %s1290_s12   ;;  %s1290_s12 = sphi %s1353_s12, %s1573_s12   ;;  %s1286_s11 = sphi %s1351_s11, %s1572_s11   ;;  %s1282_s10 = sphi %s1349_s10, %s1571_s10   ;;  %s1278_s30 = sphi %s1347_s30, %s1570_s30  }
   0x5   : > { %s1372_s15 = sadd.s32 1, %s1290_s12   ;;  %s224_s16 = sadd.s32 1, %s1286_s11 }
   0x6   : > { %s221_s17 = ssub.s32 %s1290_s12, %s1372_s15  ;;  %p234_p0 = scmp.ne.s32.totalorder %s1286_s11, %s1282_s10 }
   0x7   : > { %p222_p1 = scmp.eq.s32.totalorder %s221_s17, 0  ;;  %p235_p2 = scmp.eq.s32.totalorder %s1368_s13, 1 }
   0x8   : > { %p240_p3 = scmp.ne.s32.totalorder %s1282_s10, %s1278_s30  ;;  %p241_p4 = scmp.eq.s32.totalorder %s964_s14, 1 }
   0x9   : > { %s1383_s18 = scalar_select %p222_p1, %s1286_s11, %s224_s16  }
   0xa   : > { %p1385_p5 = por %p235_p2, %p234_p0  ;;  %p1389_p6 = por %p241_p4, %p240_p3 }
   0xb   : > { %p965_p7 = scmp.ge.s32.totalorder %s1290_s12, 1  ;;  %p248_p8 = scmp.lt.s32.totalorder %s1290_s12, 3 }
   0xc   : > { %p1118_p9 = scmp.eq.s32.totalorder %s1368_s13, 0  ;;  %s277_s23 = sshll.u32 %s1561_s7, 4  ;;  %s278_s23 = int_to_ptr.hbm [resolvable:$true] %s277_s23 }
   0xd   : > { %p249_p10 = pnand %p965_p7, %p248_p8  ;;  %s1292_s24 = smov [#allocation2]  }
   0xe   : > { %s279_s25 = sshll.u32 %s1292_s24, 4  ;;  %s1293_s26 = smov 64   ;;  %s280_s25 = int_to_ptr.vmem [resolvable:$true] %s279_s25 }
   0xf   : > { %p1110_p11 = pneg %p249_p10  ;;  %s1294_s27 = smov 4  }
  0x10   : > { %307 = sbr.rel (%p249_p10) target bundleno = 706 (0x2c2), region = 56 }
  0x11   : > { %p1111_p12 = pnand %p1118_p9, %p1110_p11 }
  0x13   : > { %1113 = dma.hbm_to_vmem [thread:$0]  (!%p1111_p12), %s278_s23, 512, %s280_s25, [#allocation3], %s1293_s26, %s1293_s26, %s1294_s27  }
  0x15   : > { %1269 = dma.done.wait (%p1118_p9), [#allocation3], 512  }
  0x16   : > { %1271 = vsyncadd (%p1118_p9), [#allocation3], 4294966784  ;;  %v1069_v0 = vld [vmem:[%s1555_s1 + $0x38] sm:$0xff]  ;;  %v1068_v1 = vld [vmem:[%s1555_s1 + $0x30] sm:$0xff]  ;;  %s971_s22 = sshll.u32 %s1368_s13, 3  ;;  %vm509_vm0 = vcmask 523264  }
  0x17   : > { %432 = vmatpush.bf16.msra.mxu0 %v1069_v0  ;;  %v1067_v2 = vld [vmem:[%s1555_s1 + $0x28] sm:$0xff]  ;;  %v1066_v3 = vld [vmem:[%s1555_s1 + $0x20] sm:$0xff]  ;;  %p345_p13 = scmp.lt.s32.totalorder %s971_s22, 15  ;;  %v1065_v4 = vld [vmem:[%s1555_s1 + $0x18] sm:$0xff]  ;;  %vm583_vm1 = vcmask 261120   ;;  %s341_s21 = sand.u32 1, %s1282_s10  }
  0x18   : > { %v1064_v5 = vld [vmem:[%s1555_s1 + $0x10] sm:$0xff]  ;;  %v1063_v6 = vld [vmem:[%s1555_s1 + $0x8] sm:$0xff]  ;;  %v1062_v7 = vld [vmem:[%s1555_s1] sm:$0xff]  ;;  %s1080_s25 = sshll.u32 %s1368_s13, 5 }
  0x19   : > { %s1575_s22 = smov (!%p345_p13, %s971_s22), 15  ;;  %v1073_v20 = vld [vmem:[%s1557_s3 + $0x18] sm:$0xff]  ;;  %v1072_v21 = vld [vmem:[%s1557_s3 + $0x10] sm:$0xff]  ;;  %v1071_v22 = vld [vmem:[%s1557_s3 + $0x8] sm:$0xff]  ;;  %s886_s27 = scalar_lea.hbm %s1563_s9, %s1080_s25 }
  0x1a   : > { %s972_s29 = sshll.u32 %s1575_s22, 3  ;;  %526 = vmatpush.bf16.msra.mxu1 %v1073_v20  ;;  %v1070_v23 = vld [vmem:[%s1557_s3] sm:$0xff]  ;;  %v1075_v53 = vld [vmem:[%s1559_s5 + $0x8] sm:$0xff]  ;;  %v1079_v20 = vld [vmem:[#allocation2 + $0x18] sm:$0xff]  ;;  %s889_s28 = sshll.u32 %s886_s27, 4  ;;  %s890_s28 = int_to_ptr.hbm [resolvable:$true] %s889_s28 }
  0x1b   : > { %433 = vmatpush.bf16.msra.mxu0 %v1068_v1  ;;  %s348_s23 = scalar_lea.vmem %s1554_s0, %s972_s29  ;;  %v1158_v25 = vld [vmem:[%s1556_s2] ss:$0 sm:$0xff]  ;;  %602 = vmatpush.bf16.msra.mxu2 %v1075_v53  ;;  %s875_s29 = scalar_lea.sflag [#allocation4], %s341_s21 }
  0x1c   : > { %v352_v8 = vld [vmem:[%s348_s23] sm:$0xff]  ;;  %v353_v9 = vld [vmem:[%s348_s23 + $0x8] sm:$0xff]  ;;  %v354_v11 = vld [vmem:[%s348_s23 + $0x10] sm:$0xff]  ;;  %689 = vmatpush.bf16.msra.mxu3 %v1079_v20  ;;  %s1238_s14 = sshra.s32 %s890_s28, 4  ;;  %s1244_s25 = scalar_lea.hbm %s1563_s9, 64  ;;  %s1239_s14 = int_to_ptr.hbm [resolvable:$true] %s1238_s14 }
  0x1d   : > { %v360_v10 = vpack.c.bf16 %v353_v9, %v352_v8  ;;  %v355_v12 = vld [vmem:[%s348_s23 + $0x18] sm:$0xff]  ;;  %v356_v14 = vld [vmem:[%s348_s23 + $0x20] sm:$0xff]  ;;  %v357_v15 = vld [vmem:[%s348_s23 + $0x28] sm:$0xff]  ;;  %s1240_s16 = scalar_lea.hbm %s1239_s14, 32  ;;  %p1245_p3 = scmp.lt.s32.totalorder %s1239_s14, %s1563_s9 }
  0x1e   : > { %v361_v13 = vpack.c.bf16 %v355_v12, %v354_v11  ;;  %v362_v16 = vpack.c.bf16 %v357_v15, %v356_v14  ;;  %v358_v17 = vld [vmem:[%s348_s23 + $0x30] sm:$0xff]  ;;  %v359_v18 = vld [vmem:[%s348_s23 + $0x38] sm:$0xff]  ;;  %527 = vmatpush.bf16.msra.mxu1 %v1072_v21  ;;  %v1074_v54 = vld [vmem:[%s1559_s5] sm:$0xff]  ;;  %s970_s23 = sshll.u32 %s341_s21, 5  ;;  %p1241_p0 = scmp.ne.s32.totalorder %s1239_s14, %s1240_s16 }
  0x1f   : > { %434 = vmatpush.bf16.msra.mxu0 %v1067_v2  ;;  %v363_v19 = vpack.c.bf16 %v359_v18, %v358_v17  ;;  %603 = vmatpush.bf16.msra.mxu2 %v1074_v54  ;;  %v1159_v56 = vld [vmem:[%s1558_s4] ss:$0 sm:$0xff]  ;;  %v1078_v21 = vld [vmem:[#allocation2 + $0x10] sm:$0xff]  ;;  %s1496_s24 = scalar_lea.vmem [#allocation5], %s970_s23  ;;  %p1246_p4 = scmp.lt.s32.totalorder %s1244_s25, %s1240_s16 }
  0x20   : > { %690 = vmatpush.bf16.msra.mxu3 %v1078_v21  ;;  %v1475_v53 = vld [vmem:[%s1562_s8] ss:$0 sm:$0xff]  ;;  %s887_s13 = sshll.u32 %s1496_s24, 4  ;;  %p1242_p1 = pnand %p1241_p0, %p1385_p5  ;;  %s888_s13 = int_to_ptr.vmem [resolvable:$true] %s887_s13 }
  0x21   : > { %p1247_p7 = por %p1246_p4, %p1245_p3 }
  0x22   : > { %528 = vmatpush.bf16.msra.mxu1 %v1071_v22  ;;  %v1077_v22 = vld [vmem:[#allocation2 + $0x8] sm:$0xff]  ;;  %p1243_p2 = pneg %p1242_p1 }
  0x23   : > { %435 = vmatpush.bf16.msra.mxu0 %v1066_v3 }
  0x24   : > { %691 = vmatpush.bf16.msra.mxu3 %v1077_v22  ;;  %p1248_p8 = pnand %p1247_p7, %p1243_p2 }
  0x26   : > { %529 = vmatpush.bf16.msra.mxu1 %v1070_v23  ;;  %v1076_v23 = vld [vmem:[#allocation2] sm:$0xff] }
  0x27   : > { %436 = vmatpush.bf16.msra.mxu0 %v1065_v4 }
  0x28   : > { %692 = vmatpush.bf16.msra.mxu3 %v1076_v23 }
  0x2b   : > { %437 = vmatpush.bf16.msra.mxu0 %v1064_v5 }
  0x2f   : > { %438 = vmatpush.bf16.msra.mxu0 %v1063_v6 }
  0x33   : > { %439 = vmatpush.bf16.msra.mxu0 %v1062_v7 }
  0x36   : > { %440 = vmatmul.bf16.vlgmr.msra.gmra.mxu0 %v360_v10 }
  0x46   : > { %445 = vmatmul.bf16.gmra.mxu0 %v361_v13 }
  0x56   : > { %450 = vmatmul.bf16.gmra.mxu0 %v362_v16 }
  0x66   : > { %455 = vmatmul.bf16.gmra.mxu0 %v363_v19 }
  0xb3   : > { %v441_v24 = vpop.f32.mrf.mxu0 }
  0xb4   : > { %v442_v26 = vadd.f32 %v1158_v25, %v441_v24 }
  0xb6   : > { %v461_v29 = vmax.f32 %v442_v26, 0.0 }
  0xbb   : > { %v443_v27 = vpop.f32.mrf.mxu0 }
  0xbc   : > { %v444_v28 = vadd.f32 %v1158_v25, %v443_v27 }
  0xbe   : > { %v462_v30 = vmax.f32 %v444_v28, 0.0 }
  0xc0   : > { %v469_v31 = vpack.c.bf16 %v462_v30, %v461_v29 }
  0xc2   : > { %1021 = vmatmul.msk.bf16.vlgmr.msra.gmra.mxu1 %vm509_vm0, %v469_v31 }
  0xc3   : > { %v446_v32 = vpop.f32.mrf.mxu0 }
  0xc4   : > { %v447_v33 = vadd.f32 %v1158_v25, %v446_v32 }
  0xc6   : > { %v463_v36 = vmax.f32 %v447_v33, 0.0 }
  0xcb   : > { %v448_v34 = vpop.f32.mrf.mxu0 }
  0xcc   : > { %v449_v35 = vadd.f32 %v1158_v25, %v448_v34 }
  0xce   : > { %v464_v37 = vmax.f32 %v449_v35, 0.0 }
  0xd0   : > { %v470_v38 = vpack.c.bf16 %v464_v37, %v463_v36 }
  0xd2   : > { %1022 = vmatmul.msk.bf16.gmra.mxu1 %vm509_vm0, %v470_v38 }
  0xd3   : > { %v451_v39 = vpop.f32.mrf.mxu0 }
  0xd4   : > { %v452_v40 = vadd.f32 %v1158_v25, %v451_v39 }
  0xd6   : > { %v465_v43 = vmax.f32 %v452_v40, 0.0 }
  0xdb   : > { %v453_v41 = vpop.f32.mrf.mxu0 }
  0xdc   : > { %v454_v42 = vadd.f32 %v1158_v25, %v453_v41 }
  0xde   : > { %v466_v44 = vmax.f32 %v454_v42, 0.0 }
  0xe0   : > { %v471_v45 = vpack.c.bf16 %v466_v44, %v465_v43 }
  0xe2   : > { %1023 = vmatmul.msk.bf16.gmra.mxu1 %vm509_vm0, %v471_v45 }
  0xe3   : > { %v456_v46 = vpop.f32.mrf.mxu0 }
  0xe4   : > { %v457_v47 = vadd.f32 %v1158_v25, %v456_v46 }
  0xe6   : > { %v467_v50 = vmax.f32 %v457_v47, 0.0 }
  0xeb   : > { %v458_v48 = vpop.f32.mrf.mxu0 }
  0xec   : > { %v459_v49 = vadd.f32 %v1158_v25, %v458_v48  ;;  %v1160_v25 = vld [vmem:[%s1560_s6] ss:$0 sm:$0xff] }
  0xee   : > { %v468_v51 = vmax.f32 %v459_v49, 0.0 }
  0xf0   : > { %v472_v52 = vpack.c.bf16 %v468_v51, %v467_v50 }
  0xf2   : > { %1024 = vmatmul.msk.bf16.gmra.mxu1 %vm509_vm0, %v472_v52 }
 0x13f   : > { %v531_v55 = vpop.f32.mrf.mxu1 }
 0x140   : > { %v532_v57 = vadd.f32 %v1159_v56, %v531_v55 }
 0x142   : > { %v551_v60 = vmax.f32 %v532_v57, 0.0 }
 0x147   : > { %v533_v58 = vpop.f32.mrf.mxu1 }
 0x148   : > { %v534_v59 = vadd.f32 %v1159_v56, %v533_v58 }
 0x14a   : > { %v552_v61 = vmax.f32 %v534_v59, 0.0 }
 0x14c   : > { %v559_v62 = vpack.c.bf16 %v552_v61, %v551_v60 }
 0x14e   : > { %1033 = vmatmul.msk.bf16.vlgmr.msra.gmra.mxu2 %vm583_vm1, %v559_v62 }
 0x14f   : > { %v536_v63 = vpop.f32.mrf.mxu1 }
 0x150   : > { %v537_v0 = vadd.f32 %v1159_v56, %v536_v63 }
 0x152   : > { %v553_v3 = vmax.f32 %v537_v0, 0.0 }
 0x157   : > { %v538_v1 = vpop.f32.mrf.mxu1 }
 0x158   : > { %v539_v2 = vadd.f32 %v1159_v56, %v538_v1 }
 0x15a   : > { %v554_v4 = vmax.f32 %v539_v2, 0.0 }
 0x15c   : > { %v560_v5 = vpack.c.bf16 %v554_v4, %v553_v3 }
 0x15e   : > { %1034 = vmatmul.msk.bf16.gmra.mxu2 %vm583_vm1, %v560_v5 }
 0x15f   : > { %v541_v6 = vpop.f32.mrf.mxu1 }
 0x160   : > { %v542_v7 = vadd.f32 %v1159_v56, %v541_v6 }
 0x162   : > { %v555_v10 = vmax.f32 %v542_v7, 0.0 }
 0x167   : > { %v543_v8 = vpop.f32.mrf.mxu1 }
 0x168   : > { %v544_v9 = vadd.f32 %v1159_v56, %v543_v8 }
 0x16a   : > { %v556_v11 = vmax.f32 %v544_v9, 0.0 }
 0x16c   : > { %v561_v12 = vpack.c.bf16 %v556_v11, %v555_v10 }
 0x16e   : > { %1035 = vmatmul.msk.bf16.gmra.mxu2 %vm583_vm1, %v561_v12 }
 0x16f   : > { %v546_v13 = vpop.f32.mrf.mxu1 }
 0x170   : > { %v547_v14 = vadd.f32 %v1159_v56, %v546_v13 }
 0x172   : > { %v557_v17 = vmax.f32 %v547_v14, 0.0 }
 0x177   : > { %v548_v15 = vpop.f32.mrf.mxu1 }
 0x178   : > { %v549_v16 = vadd.f32 %v1159_v56, %v548_v15 }
 0x17a   : > { %v558_v18 = vmax.f32 %v549_v16, 0.0 }
 0x17c   : > { %v562_v19 = vpack.c.bf16 %v558_v18, %v557_v17 }
 0x17e   : > { %1036 = vmatmul.msk.bf16.gmra.mxu2 %vm583_vm1, %v562_v19 }
 0x1d1   : > { %v605_v24 = vpop.f32.mrf.mxu2 }
 0x1d2   : > { %v606_v26 = vadd.f32 %v1160_v25, %v605_v24 }
 0x1d4   : > { %v625_v29 = vmax.f32 %v606_v26, 0.0 }
 0x1d9   : > { %v607_v27 = vpop.f32.mrf.mxu2 }
 0x1da   : > { %v608_v28 = vadd.f32 %v1160_v25, %v607_v27 }
 0x1dc   : > { %v626_v30 = vmax.f32 %v608_v28, 0.0 }
 0x1de   : > { %v633_v31 = vpack.c.bf16 %v626_v30, %v625_v29 }
 0x1e0   : > { %1053 = vmatmul.msk.bf16.vlgmr.msra.gmra.mxu3 %vm509_vm0, %v633_v31 }
 0x1e1   : > { %v610_v32 = vpop.f32.mrf.mxu2 }
 0x1e2   : > { %v611_v33 = vadd.f32 %v1160_v25, %v610_v32 }
 0x1e4   : > { %v627_v36 = vmax.f32 %v611_v33, 0.0 }
 0x1e9   : > { %v612_v34 = vpop.f32.mrf.mxu2 }
 0x1ea   : > { %v613_v35 = vadd.f32 %v1160_v25, %v612_v34 }
 0x1ec   : > { %v628_v37 = vmax.f32 %v613_v35, 0.0 }
 0x1ee   : > { %v634_v38 = vpack.c.bf16 %v628_v37, %v627_v36 }
 0x1f0   : > { %1054 = vmatmul.msk.bf16.gmra.mxu3 %vm509_vm0, %v634_v38 }
 0x1f1   : > { %v615_v39 = vpop.f32.mrf.mxu2 }
 0x1f2   : > { %v616_v40 = vadd.f32 %v1160_v25, %v615_v39 }
 0x1f4   : > { %v629_v43 = vmax.f32 %v616_v40, 0.0 }
 0x1f9   : > { %v617_v41 = vpop.f32.mrf.mxu2 }
 0x1fa   : > { %v618_v42 = vadd.f32 %v1160_v25, %v617_v41 }
 0x1fc   : > { %v630_v44 = vmax.f32 %v618_v42, 0.0 }
 0x1fe   : > { %v635_v45 = vpack.c.bf16 %v630_v44, %v629_v43 }
 0x200   : > { %1055 = vmatmul.msk.bf16.gmra.mxu3 %vm509_vm0, %v635_v45 }
 0x201   : > { %v620_v46 = vpop.f32.mrf.mxu2 }
 0x202   : > { %v621_v47 = vadd.f32 %v1160_v25, %v620_v46 }
 0x204   : > { %v631_v50 = vmax.f32 %v621_v47, 0.0 }
 0x209   : > { %v622_v48 = vpop.f32.mrf.mxu2 }
 0x20a   : > { %v623_v49 = vadd.f32 %v1160_v25, %v622_v48 }
 0x20c   : > { %v632_v51 = vmax.f32 %v623_v49, 0.0 }
 0x20e   : > { %v636_v52 = vpack.c.bf16 %v632_v51, %v631_v50 }
 0x210   : > { %1056 = vmatmul.msk.bf16.gmra.mxu3 %vm509_vm0, %v636_v52 }
 0x263   : > { %v694_v54 = vpop.f32.mrf.mxu3 }
 0x264   : > { %v695_v55 = vadd.f32 %v1475_v53, %v694_v54 }
 0x266   : > { %v714_v56 = vsub.f32 0.0, %v695_v55 }
 0x268   : > { %v722_v57 = vmul.f32 1.442695, %v714_v56 }
 0x26a   : > { %1162 = vpow2.f32 %v722_v57 }
 0x26b   : > { %v696_v58 = vpop.f32.mrf.mxu3 }
 0x26c   : > { %v697_v59 = vadd.f32 %v1475_v53, %v696_v58 }
 0x26e   : > { %v715_v60 = vsub.f32 0.0, %v697_v59 }
 0x270   : > { %v1163_v61 = vpop.eup %1162  ;;  %v724_v62 = vmul.f32 1.442695, %v715_v60 }
 0x271   : > { %v738_v63 = vadd.f32 1.0, %v1163_v61 }
 0x272   : > { %1164 = vpow2.f32 %v724_v62 }
 0x273   : > { %1166 = vrcp.f32 %v738_v63  ;;  %v699_v0 = vpop.f32.mrf.mxu3  ;;  %vm751_vm3 = vweird.f32 %v738_v63  ;;  %v755_v22 = vand.u32 2147483647, %v738_v63  ;;  %v757_v23 = vand.u32 2147483648, %v738_v63 }
 0x274   : > { %v700_v1 = vadd.f32 %v1475_v53, %v699_v0 }
 0x275   : > { %vm756_vm7 = vcmp.eq.f32.partialorder %v755_v22, 8.507059e+37  ;;  %v758_v34 = vor.u32 1.1754944e-38, %v757_v23 }
 0x276   : > { %v716_v2 = vsub.f32 0.0, %v700_v1 }
 0x278   : > { %v1165_v3 = vpop.eup %1164  ;;  %v726_v4 = vmul.f32 1.442695, %v716_v2 }
 0x279   : > { %v1167_v5 = vpop.eup %1166  ;;  %v739_v6 = vadd.f32 1.0, %v1165_v3 }
 0x27a   : > { %v747_v7 = vmul.f32 %v1167_v5, %v738_v63  ;;  %1168 = vpow2.f32 %v726_v4  ;;  %vm752_vm2 = vweird.f32 %v1167_v5 }
 0x27b   : > { %1170 = vrcp.f32 %v739_v6  ;;  %v701_v8 = vpop.f32.mrf.mxu3  ;;  %v771_v24 = vand.u32 2147483648, %v739_v6  ;;  %v769_v26 = vand.u32 2147483647, %v739_v6  ;;  %vm1486_vm5 = vmor %vm751_vm3, %vm752_vm2  ;;  %vm765_vm6 = vweird.f32 %v739_v6 }
 0x27c   : > { %v748_v9 = vsub.f32 1.0, %v747_v7  ;;  %v702_v10 = vadd.f32 %v1475_v53, %v701_v8 }
 0x27d   : > { %v772_v35 = vor.u32 1.1754944e-38, %v771_v24  ;;  %vm770_vm9 = vcmp.eq.f32.partialorder %v769_v26, 8.507059e+37 }
 0x27e   : > { %v717_v11 = vsub.f32 0.0, %v702_v10  ;;  %v749_v13 = vmul.f32 %v1167_v5, %v748_v9 }
 0x280   : > { %v1169_v12 = vpop.eup %1168  ;;  %v728_v14 = vmul.f32 1.442695, %v717_v11  ;;  %v750_v19 = vadd.f32 %v1167_v5, %v749_v13 }
 0x281   : > { %v1171_v15 = vpop.eup %1170  ;;  %v1481_v16 = vadd.f32 1.0, %v1169_v12 }
 0x282   : > { %v761_v17 = vmul.f32 %v1171_v15, %v739_v6  ;;  %1172 = vpow2.f32 %v728_v14  ;;  %vm766_vm4 = vweird.f32 %v1171_v15  ;;  %v754_v30 = vsel %vm1486_vm5, %v1167_v5, %v750_v19 }
 0x283   : > { %1174 = vrcp.f32 %v1481_v16  ;;  %v704_v18 = vpop.f32.mrf.mxu3  ;;  %vm767_vm8 = vmor %vm765_vm6, %vm766_vm4  ;;  %v759_v39 = vsel %vm756_vm7, %v758_v34, %v754_v30  ;;  %vm779_vm11 = vweird.f32 %v1481_v16  ;;  %v783_v57 = vand.u32 2147483647, %v1481_v16 }
 0x284   : > { %v762_v20 = vsub.f32 1.0, %v761_v17  ;;  %v705_v21 = vadd.f32 %v1475_v53, %v704_v18  ;;  %v785_v58 = vand.u32 2147483648, %v1481_v16 }
 0x285   : > { %vm784_vm15 = vcmp.eq.f32.partialorder %v783_v57, 8.507059e+37 }
 0x286   : > { %v763_v25 = vmul.f32 %v1171_v15, %v762_v20  ;;  %v718_v27 = vsub.f32 0.0, %v705_v21  ;;  %v786_v5 = vor.u32 1.1754944e-38, %v785_v58 }
 0x288   : > { %v1173_v29 = vpop.eup %1172  ;;  %v764_v31 = vadd.f32 %v1171_v15, %v763_v25  ;;  %v730_v32 = vmul.f32 1.442695, %v718_v27 }
 0x289   : > { %v1175_v33 = vpop.eup %1174  ;;  %v741_v36 = vadd.f32 1.0, %v1173_v29 }
 0x28a   : > { %v768_v37 = vsel %vm767_vm8, %v1171_v15, %v764_v31  ;;  %v775_v38 = vmul.f32 %v1175_v33, %v1481_v16  ;;  %1176 = vpow2.f32 %v730_v32  ;;  %vm780_vm10 = vweird.f32 %v1175_v33 }
 0x28b   : > { %v773_v40 = vsel %vm770_vm9, %v772_v35, %v768_v37  ;;  %1178 = vrcp.f32 %v741_v36  ;;  %v706_v41 = vpop.f32.mrf.mxu3  ;;  %v799_v59 = vand.u32 2147483648, %v741_v36  ;;  %v797_v61 = vand.u32 2147483647, %v741_v36  ;;  %vm1506_vm13 = vmor %vm779_vm11, %vm780_vm10 }
 0x28c   : > { %v1084_v42 = vpack.c.bf16 %v773_v40, %v759_v39  ;;  %v776_v43 = vsub.f32 1.0, %v775_v38  ;;  %v707_v44 = vadd.f32 %v1475_v53, %v706_v41  ;;  %vm793_vm14 = vweird.f32 %v741_v36 }
 0x28d   : > { %v800_v6 = vor.u32 1.1754944e-38, %v799_v59  ;;  %vm798_vm1 = vcmp.eq.f32.partialorder %v797_v61, 8.507059e+37 }
 0x28e   : > { %v719_v45 = vsub.f32 0.0, %v707_v44  ;;  %1085 = vst [vmem:[%s1496_s24] sm:$0xff] %v1084_v42   ;;  %v777_v47 = vmul.f32 %v1175_v33, %v776_v43 }
 0x290   : > { %v1177_v46 = vpop.eup %1176  ;;  %v732_v48 = vmul.f32 1.442695, %v719_v45  ;;  %v778_v54 = vadd.f32 %v1175_v33, %v777_v47 }
 0x291   : > { %v1179_v49 = vpop.eup %1178  ;;  %v1499_v50 = vadd.f32 1.0, %v1177_v46 }
 0x292   : > { %v789_v51 = vmul.f32 %v1179_v49, %v741_v36  ;;  %1180 = vpow2.f32 %v732_v48  ;;  %vm794_vm12 = vweird.f32 %v1179_v49  ;;  %v782_v1 = vsel %vm1506_vm13, %v1175_v33, %v778_v54 }
 0x293   : > { %1182 = vrcp.f32 %v1499_v50  ;;  %v709_v52 = vpop.f32.mrf.mxu3  ;;  %vm795_vm0 = vmor %vm793_vm14, %vm794_vm12  ;;  %v787_v10 = vsel %vm784_vm15, %v786_v5, %v782_v1  ;;  %vm807_vm3 = vweird.f32 %v1499_v50  ;;  %v813_v25 = vand.u32 2147483648, %v1499_v50 }
 0x294   : > { %v790_v55 = vsub.f32 1.0, %v789_v51  ;;  %v710_v56 = vadd.f32 %v1475_v53, %v709_v52 }
 0x295   : > { %v814_v33 = vor.u32 1.1754944e-38, %v813_v25 }
 0x296   : > { %v791_v60 = vmul.f32 %v1179_v49, %v790_v55  ;;  %v720_v62 = vsub.f32 0.0, %v710_v56 }
 0x298   : > { %v1181_v0 = vpop.eup %1180  ;;  %v792_v2 = vadd.f32 %v1179_v49, %v791_v60  ;;  %v734_v3 = vmul.f32 1.442695, %v720_v62 }
 0x299   : > { %v1183_v4 = vpop.eup %1182  ;;  %v743_v7 = vadd.f32 1.0, %v1181_v0 }
 0x29a   : > { %v796_v8 = vsel %vm795_vm0, %v1179_v49, %v792_v2  ;;  %v803_v9 = vmul.f32 %v1183_v4, %v1499_v50  ;;  %1184 = vpow2.f32 %v734_v3  ;;  %vm808_vm2 = vweird.f32 %v1183_v4 }
 0x29b   : > { %v801_v11 = vsel %vm798_vm1, %v800_v6, %v796_v8  ;;  %1186 = vrcp.f32 %v743_v7  ;;  %v711_v12 = vpop.f32.mrf.mxu3  ;;  %v827_v26 = vand.u32 2147483648, %v743_v7  ;;  %v825_v28 = vand.u32 2147483647, %v743_v7  ;;  %vm809_vm5 = vmor %vm807_vm3, %vm808_vm2 }
 0x29c   : > { %v1089_v13 = vpack.c.bf16 %v801_v11, %v787_v10  ;;  %v804_v14 = vsub.f32 1.0, %v803_v9  ;;  %v712_v15 = vadd.f32 %v1475_v53, %v711_v12  ;;  %v811_v53 = vand.u32 2147483647, %v1499_v50 }
 0x29d   : > { %vm821_vm6 = vweird.f32 %v743_v7  ;;  %v828_v34 = vor.u32 1.1754944e-38, %v827_v26  ;;  %vm826_vm9 = vcmp.eq.f32.partialorder %v825_v28, 8.507059e+37 }
 0x29e   : > { %v721_v16 = vsub.f32 0.0, %v712_v15  ;;  %1101 = vst [vmem:[%s1496_s24 + $0x8] sm:$0xff] %v1089_v13   ;;  %v805_v18 = vmul.f32 %v1183_v4, %v804_v14  ;;  %vm812_vm8 = vcmp.eq.f32.partialorder %v811_v53, 8.507059e+37 }
 0x2a0   : > { %v1185_v17 = vpop.eup %1184  ;;  %v736_v19 = vmul.f32 1.442695, %v721_v16  ;;  %v806_v23 = vadd.f32 %v1183_v4, %v805_v18 }
 0x2a1   : > { %v1187_v20 = vpop.eup %1186  ;;  %v744_v21 = vadd.f32 1.0, %v1185_v17 }
 0x2a2   : > { %v817_v22 = vmul.f32 %v1187_v20, %v743_v7  ;;  %1188 = vpow2.f32 %v736_v19  ;;  %vm822_vm4 = vweird.f32 %v1187_v20  ;;  %v810_v30 = vsel %vm809_vm5, %v1183_v4, %v806_v23 }
 0x2a3   : > { %1190 = vrcp.f32 %v744_v21  ;;  %vm823_vm7 = vmor %vm821_vm6, %vm822_vm4  ;;  %v815_v38 = vsel %vm812_vm8, %v814_v33, %v810_v30  ;;  %vm835_vm11 = vweird.f32 %v744_v21  ;;  %v841_v47 = vand.u32 2147483648, %v744_v21 }
 0x2a4   : > { %v818_v24 = vsub.f32 1.0, %v817_v22  ;;  %v839_v49 = vand.u32 2147483647, %v744_v21 }
 0x2a5   : > { %v842_v55 = vor.u32 1.1754944e-38, %v841_v47 }
 0x2a6   : > { %v819_v27 = vmul.f32 %v1187_v20, %v818_v24  ;;  %vm840_vm0 = vcmp.eq.f32.partialorder %v839_v49, 8.507059e+37 }
 0x2a8   : > { %v1189_v29 = vpop.eup %1188  ;;  %v820_v31 = vadd.f32 %v1187_v20, %v819_v27 }
 0x2a9   : > { %v1191_v32 = vpop.eup %1190  ;;  %v745_v35 = vadd.f32 1.0, %v1189_v29 }
 0x2aa   : > { %v824_v36 = vsel %vm823_vm7, %v1187_v20, %v820_v31  ;;  %v831_v37 = vmul.f32 %v1191_v32, %v744_v21  ;;  %vm836_vm10 = vweird.f32 %v1191_v32 }
 0x2ab   : > { %v829_v39 = vsel %vm826_vm9, %v828_v34, %v824_v36  ;;  %1192 = vrcp.f32 %v745_v35  ;;  %v855_v48 = vand.u32 2147483648, %v745_v35  ;;  %v853_v51 = vand.u32 2147483647, %v745_v35  ;;  %vm837_vm13 = vmor %vm835_vm11, %vm836_vm10 }
 0x2ac   : > { %v1094_v40 = vpack.c.bf16 %v829_v39, %v815_v38  ;;  %v832_v41 = vsub.f32 1.0, %v831_v37  ;;  %vm849_vm14 = vweird.f32 %v745_v35 }
 0x2ad   : > { %v856_v56 = vor.u32 1.1754944e-38, %v855_v48  ;;  %vm854_vm1 = vcmp.eq.f32.partialorder %v853_v51, 8.507059e+37 }
 0x2ae   : > { %1102 = vst [vmem:[%s1496_s24 + $0x10] sm:$0xff] %v1094_v40   ;;  %v833_v42 = vmul.f32 %v1191_v32, %v832_v41 }
 0x2b0   : > { %v834_v45 = vadd.f32 %v1191_v32, %v833_v42 }
 0x2b1   : > { %v1193_v43 = vpop.eup %1192 }
 0x2b2   : > { %v845_v44 = vmul.f32 %v1193_v43, %v745_v35  ;;  %vm850_vm12 = vweird.f32 %v1193_v43  ;;  %v838_v52 = vsel %vm837_vm13, %v1191_v32, %v834_v45 }
 0x2b3   : > { %vm851_vm15 = vmor %vm849_vm14, %vm850_vm12  ;;  %v843_v58 = vsel %vm840_vm0, %v842_v55, %v838_v52 }
 0x2b4   : > { %v846_v46 = vsub.f32 1.0, %v845_v44 }
 0x2b6   : > { %v847_v50 = vmul.f32 %v1193_v43, %v846_v46 }
 0x2b8   : > { %v848_v54 = vadd.f32 %v1193_v43, %v847_v50 }
 0x2ba   : > { %v852_v57 = vsel %vm851_vm15, %v1193_v43, %v848_v54 }
 0x2bb   : > { %v857_v59 = vsel %vm854_vm1, %v856_v56, %v852_v57 }
 0x2bc   : > { %v1099_v60 = vpack.c.bf16 %v857_v59, %v843_v58 }
 0x2be   : > { %1103 = vst [vmem:[%s1496_s24 + $0x18] sm:$0xff] %v1099_v60  }
 0x2bf   : > { %1251 = shalt.err (!%p1248_p8)
}
 0x2c0   : > { %s1295_s21 = smov 64   ;;  %s1296_s24 = smov 4  }
 0x2c1   : > { %1108 = dma.vmem_to_hbm [thread:$0]  (%p1385_p5), %s888_s13, 512, %s890_s28, %s875_s29, %s1295_s21, %s1295_s21, %s1296_s24  }
 0x2c2 PF: > { %p1120_p9 = scmp.ge.s32.totalorder %s1290_s12, 2  ;;  %s904_s27 = sand.u32 1, %s1278_s30  }
 0x2c3   : > { %s905_s17 = scalar_lea.sflag [#allocation4], %s904_s27 }
 0x2c4   : > { %p1115_p10 = pnand %p1120_p9, %p1389_p6 }
 0x2c6   : > { %p1116_p11 = pneg %p1115_p10 }
 0x2c8   : > { %1273 = dma.done.wait (%p1116_p11), %s905_s17, 512  }
 0x2c9   : > { %1275 = vsyncadd (%p1116_p11), %s905_s17, 4294966784  ;;  %p20_p12 = scmp.ge.s32.totalorder %s1372_s15, 4   ;;  %s1570_s30 = smov %s1282_s10 }
 0x2ca   : > { %s1571_s10 = smov %s1286_s11  ;;  %s1572_s11 = smov %s1383_s18 }
 0x2cb   : > { %s1573_s12 = smov %s1372_s15  ;;  %22 = sbr.rel (!%p20_p12) target bundleno = 4 (0x4), region = 96 }
 0x2d0   :  { %911 = vsyncpa [#allocation3], 1 }
 0x2d1   :  { %913 = vsyncpa [#allocation3 + $0x1], 1 }
 0x2d2   :  { %914 = vsyncpa [#allocation4], 1 }
 0x2d3   :  { %916 = vsyncpa [#allocation4 + $0x1], 1 }

</bundles_post_ra>
